<compile_context>
chip_gen: v7x
topology: tpu7x:2x2x1
jax: 0.10.0
libtpu: 0.0.40
codegen_flags: <defaults>
</compile_context>

<pallas_src>
import jax
import jax.numpy as jnp
from jax.experimental import pallas as pl
from jax.experimental.pallas import tpu as pltpu

_LANES = 128


def _make_ft_kernel(B, TB, need_row_mask):
    """Build the per-tile kernel; B/TB/mask-need are static (closed over)."""

    def kernel(s_ref, t_ref, out_ref):
        s = s_ref[...].astype(jnp.float32)
        t = t_ref[...].astype(jnp.float32)

        if need_row_mask:
            # Last grid step reads past row B; those rows hold unspecified data
            # in the padded DMA buffer -> select them to 0 BEFORE any math.
            # A zero row normalizes to zeros under the eps clamp, contributing 0.
            row = jax.lax.broadcasted_iota(jnp.int32, s.shape, 0)
            valid = (pl.program_id(0) * TB + row) < B
            s = jnp.where(valid, s, 0.0)
            t = jnp.where(valid, t, 0.0)

        # torch F.normalize: x / clamp_min(||x||_2, 1e-12)
        # == x * rsqrt(clamp_min(sum(x^2), 1e-24))   (EUP rsqrt, no divides)
        eps2 = jnp.float32(1e-24)
        s_inv = jax.lax.rsqrt(jnp.maximum(jnp.sum(s * s, axis=-1, keepdims=True), eps2))
        t_inv = jax.lax.rsqrt(jnp.maximum(jnp.sum(t * t, axis=-1, keepdims=True), eps2))

        partial = jnp.sum(jnp.abs(s * s_inv - t * t_inv))
        # Lane-dense store (full 128 lanes) instead of a 1-element masked store.
        out_ref[...] = jnp.full((1, _LANES), partial, dtype=jnp.float32)

    return kernel


def _vmem_capacity_bytes():
    try:
        cap = getattr(pltpu.get_tpu_info(), "vmem_capacity_bytes", None)
        if cap:
            return int(cap)
    except Exception:
        pass
    return 128 * 1024 * 1024  # v5e/v6e default


def _choose_tiling(B, D, itemsize):
    """Return (TB, vmem_limit_bytes) — generation- and dtype-aware."""
    vmem_cap = _vmem_capacity_bytes()
    big_vmem = vmem_cap >= 100 * 1024 * 1024          # v5e/v6e: 128 MiB; v7x: 64 MiB/TC
    vmem_limit = (64 if big_vmem else 40) * 1024 * 1024

    if B <= 8:
        return B, vmem_limit                          # single full-batch block

    # Real per-row VMEM footprint: 2 inputs x 2 pipeline buffers at the HBM
    # dtype plus ~4 f32 temporaries materialized by the kernel body.
    row_bytes = D * (4 * itemsize + 16)
    budget = (48 if big_vmem else 24) * 1024 * 1024
    vmem_rows = max(8, (budget // row_bytes) // 8 * 8)

    # Keep >=2 grid steps (>=4 for larger batches) so the pipeline actually
    # double-buffers and v7x's second TensorCore gets a "parallel" shard.
    min_steps = 4 if B >= 64 else 2
    split_rows = max(8, ((B + min_steps - 1) // min_steps) // 8 * 8)

    return min(vmem_rows, split_rows), vmem_limit


def ft_loss(factor_s, factor_t, beta=100.0):
    """Pallas implementation of FT.forward(factor_s, factor_t)."""
    assert factor_s.shape == factor_t.shape
    B = factor_s.shape[0]
    # Same element order as torch .view(B, -1); dtype kept narrow in HBM.
    s2 = factor_s.reshape(B, -1)
    t2 = factor_t.reshape(B, -1)
    D = s2.shape[1]
    itemsize = jnp.dtype(s2.dtype).itemsize

    TB, vmem_limit = _choose_tiling(B, D, itemsize)
    T = pl.cdiv(B, TB)                   # no host-side padding copy
    need_row_mask = (B % TB) != 0

    # Note: block last dim == full D, so any D is legal for the BlockSpec; the
    # compiler masks physical lane padding for non-multiple-of-128 D.
    kernel = _make_ft_kernel(B, TB, need_row_mask)
    partials = pl.pallas_call(
        kernel,
        out_shape=jax.ShapeDtypeStruct((T, 1, _LANES), jnp.float32),
        grid=(T,),
        in_specs=[
            pl.BlockSpec((TB, D), lambda i: (i, 0)),
            pl.BlockSpec((TB, D), lambda i: (i, 0)),
        ],
        out_specs=pl.BlockSpec((None, 1, _LANES), lambda i: (i, 0, 0)),
        compiler_params=pltpu.CompilerParams(
            dimension_semantics=("parallel",),
            vmem_limit_bytes=vmem_limit,
        ),
        cost_estimate=pl.CostEstimate(
            flops=int(9 * B * D),
            transcendentals=int(2 * B),
            bytes_accessed=int(2 * B * D * itemsize + T * _LANES * 4),
        ),
    )(s2, t2)

    # Mean over the ORIGINAL B*D elements, scaled by beta.
    return (jnp.float32(beta) / jnp.float32(B * D)) * jnp.sum(partials[:, 0, 0])


def _ft_loss_ref(factor_s, factor_t, beta=100.0):
    """Pure-JAX reference mirroring the PyTorch module."""
    B = factor_s.shape[0]
    s2 = factor_s.reshape(B, -1).astype(jnp.float32)
    t2 = factor_t.reshape(B, -1).astype(jnp.float32)
    eps = 1e-12
    s_n = s2 / jnp.maximum(jnp.linalg.norm(s2, axis=1, keepdims=True), eps)
    t_n = t2 / jnp.maximum(jnp.linalg.norm(t2, axis=1, keepdims=True), eps)
    return beta * jnp.mean(jnp.abs(s_n - t_n))


def _check(shape, dtype, key):
    ks, kt = jax.random.split(key)
    factor_s = jax.random.normal(ks, shape, dtype=dtype)
    factor_t = jax.random.normal(kt, shape, dtype=dtype)
    loss = jax.block_until_ready(ft_loss(factor_s, factor_t, beta=100.0))
    ref = jax.block_until_ready(_ft_loss_ref(factor_s, factor_t, beta=100.0))
    assert jnp.isfinite(loss), ("non-finite loss", shape, dtype)
    assert jnp.allclose(loss, ref, rtol=1e-4, atol=1e-5), (shape, dtype, loss, ref)


if __name__ == "__main__":
    key = jax.random.PRNGKey(0)
    k1, k2, k3 = jax.random.split(key, 3)

    # Small NCHW factors matching the FT paper setting (paraphraser outputs).
    _check((2, 4, 16, 16), jnp.float32, k1)      # tiny batch: single-block path
    _check((48, 16, 32, 32), jnp.float32, k2)    # multi-tile "parallel" path (T>=2)
    _check((10, 8, 16, 16), jnp.bfloat16, k3)    # ragged batch (row mask) + bf16 in HBM

    print("KERNEL_OK")
</pallas_src>

<mosaic_0001>
module attributes {stable_mosaic.version = 11 : i64} {
  func.func @kernel(%arg0: i32, %arg1: memref<2x1024xf32, #tpu.memory_space<vmem>>, %arg2: memref<2x1024xf32, #tpu.memory_space<vmem>>, %arg3: memref<1x1x128xf32, #tpu.memory_space<vmem>>) attributes {dimension_semantics = [#tpu.dimension_semantics<parallel>], iteration_bounds = array<i64: 1>, scalar_prefetch = 0 : i64, scratch_operands = 0 : i64, tpu.core_type = #tpu.core_type<tc>, window_params = [{transform_indices = @transform_0, window_bounds = array<i64: 2, 1024>}, {transform_indices = @transform_1, window_bounds = array<i64: 2, 1024>}, {transform_indices = @transform_2, window_bounds = array<i64: 1, 1, 128>}]} {
    %c0 = arith.constant 0 : index
    %c0_0 = arith.constant 0 : index
    %0 = vector.load %arg1[%c0, %c0_0] : memref<2x1024xf32, #tpu.memory_space<vmem>>, vector<2x1024xf32>
    %c0_1 = arith.constant 0 : index
    %c0_2 = arith.constant 0 : index
    %1 = vector.load %arg2[%c0_1, %c0_2] : memref<2x1024xf32, #tpu.memory_space<vmem>>, vector<2x1024xf32>
    %2 = arith.mulf %0, %0 : vector<2x1024xf32>
    %cst = arith.constant dense<0.000000e+00> : vector<2xf32>
    %3 = vector.multi_reduction <add>, %2, %cst [1] : vector<2x1024xf32> to vector<2xf32>
    %4 = vector.shape_cast %3 : vector<2xf32> to vector<2x1xf32>
    %cst_3 = arith.constant 1.000000e-24 : f32
    %5 = vector.broadcast %cst_3 : f32 to vector<2x1xf32>
    %6 = arith.maximumf %4, %5 : vector<2x1xf32>
    %7 = math.rsqrt %6 : vector<2x1xf32>
    %8 = arith.mulf %1, %1 : vector<2x1024xf32>
    %cst_4 = arith.constant dense<0.000000e+00> : vector<2xf32>
    %9 = vector.multi_reduction <add>, %8, %cst_4 [1] : vector<2x1024xf32> to vector<2xf32>
    %10 = vector.shape_cast %9 : vector<2xf32> to vector<2x1xf32>
    %cst_5 = arith.constant 1.000000e-24 : f32
    %11 = vector.broadcast %cst_5 : f32 to vector<2x1xf32>
    %12 = arith.maximumf %10, %11 : vector<2x1xf32>
    %13 = math.rsqrt %12 : vector<2x1xf32>
    %14 = vector.broadcast %7 : vector<2x1xf32> to vector<2x1024xf32>
    %15 = arith.mulf %0, %14 : vector<2x1024xf32>
    %16 = vector.broadcast %13 : vector<2x1xf32> to vector<2x1024xf32>
    %17 = arith.mulf %1, %16 : vector<2x1024xf32>
    %18 = arith.subf %15, %17 : vector<2x1024xf32>
    %19 = math.absf %18 : vector<2x1024xf32>
    %20 = vector.shape_cast %19 : vector<2x1024xf32> to vector<1x2x1024xf32>
    %cst_6 = arith.constant dense<0.000000e+00> : vector<1xf32>
    %21 = vector.multi_reduction <add>, %20, %cst_6 [1, 2] : vector<1x2x1024xf32> to vector<1xf32>
    %22 = vector.shape_cast %21 : vector<1xf32> to vector<1x1x1xf32>
    %23 = vector.extract %22[0, 0, 0] : f32 from vector<1x1x1xf32>
    %24 = vector.broadcast %23 : f32 to vector<1x128xf32>
    %c0_7 = arith.constant 0 : index
    %c0_8 = arith.constant 0 : index
    %c0_9 = arith.constant 0 : index
    %25 = vector.load %arg3[%c0_7, %c0_8, %c0_9] : memref<1x1x128xf32, #tpu.memory_space<vmem>>, vector<1x1x128xf32>
    %26 = vector.shape_cast %25 : vector<1x1x128xf32> to vector<1x128xf32>
    %27 = vector.shape_cast %24 : vector<1x128xf32> to vector<1x1x128xf32>
    tpu.vector_store %arg3[%c0_7, %c0_8, %c0_9], %27 {strides = array<i32>} : memref<1x1x128xf32, #tpu.memory_space<vmem>>, vector<1x1x128xf32>,
    return
  }
  func.func @transform_0(%arg0: i32) -> (i32, i32) {
    %c0_i32 = arith.constant 0 : i32
    %c0_i32_0 = arith.constant 0 : i32
    return %arg0, %c0_i32 : i32, i32
  }
  func.func @transform_1(%arg0: i32) -> (i32, i32) {
    %c0_i32 = arith.constant 0 : i32
    %c0_i32_0 = arith.constant 0 : i32
    return %arg0, %c0_i32 : i32, i32
  }
  func.func @transform_2(%arg0: i32) -> (i32, i32, i32) {
    %c0_i32 = arith.constant 0 : i32
    %c0_i32_0 = arith.constant 0 : i32
    %c0_i32_1 = arith.constant 0 : i32
    return %arg0, %c0_i32, %c0_i32_0 : i32, i32, i32
  }
}

</mosaic_0001>

<bundles_post_ra>
// kernel: tpu_custom_call.1
= control target key start
LH: loop header
LB: loop body
LE: loop exit
PB: predicated region body
PF: predicated region fallthrough
CT: control target
= control target key end

     0   :  { %7 = vsyncpa [#allocation3], 0  ;;  %s484_s0 = inlined_call_operand.hbm [shape: f32[2,1024], index: 0, kind: input, shape index: {}]   ;;  %s485_s1 = inlined_call_operand.hbm [shape: f32[2,1024], index: 1, kind: input, shape index: {}]   ;;  %s486_s2 = inlined_call_operand.hbm [shape: f32[1,1,128], index: 2, kind: output, shape index: {}]  }
   0x1   :  { %8 = vsyncpa [#allocation6], 0 }
   0x2   :  { %9 = vsyncpa [#allocation4], 0  ;;  %s366_s9 = smov [#allocation2]   ;;  %s367_s11 = smov [#allocation5]  }
   0x3   :  { %s16_s10 = sshll.u32 %s366_s9, 4  ;;  %s26_s12 = sshll.u32 %s367_s11, 4  ;;  %s17_s10 = int_to_ptr.vmem [resolvable:$true] %s16_s10  ;;  %s27_s12 = int_to_ptr.vmem [resolvable:$true] %s26_s12 }
   0x4   :  { %s294_s15 = scalar_lea.hbm %s484_s0, 256 }
   0x5   :  { %p295_p0 = scmp.ne.s32.totalorder %s484_s0, %s294_s15  ;;  %p298_p1 = scmp.lt.u32.totalorder %s294_s15, %s484_s0 }
   0x7   :  { %p300_p2 = pnand %p298_p1, %p295_p0 }
   0x9   :  { %303 = shalt.err (!%p300_p2)
}
   0xa   :  { %s304_s20 = scalar_lea.vmem %s17_s10, 256  ;;  %p309_p4 = scmp.lt.s32.totalorder %s17_s10, %s17_s10 }
   0xb   :  { %p305_p3 = scmp.ne.s32.totalorder %s17_s10, %s304_s20  ;;  %p310_p5 = scmp.lt.s32.totalorder %s304_s20, %s304_s20 }
   0xd   :  { %p311_p6 = por %p310_p5, %p309_p4 }
   0xf   :  { %p312_p7 = pnand %p311_p6, %p305_p3 }
  0x11   :  { %315 = shalt.err (!%p312_p7)
}
  0x12   :  { %19 = dma.hbm_to_vmem [thread:$0]  %s484_s0, 256, %s17_s10, [#allocation3]  }
  0x13   :  { %s316_s25 = scalar_lea.hbm %s485_s1, 256 }
  0x14   :  { %p317_p8 = scmp.ne.s32.totalorder %s485_s1, %s316_s25  ;;  %p320_p9 = scmp.lt.u32.totalorder %s316_s25, %s485_s1 }
  0x16   :  { %p322_p10 = pnand %p320_p9, %p317_p8 }
  0x18   :  { %325 = shalt.err (!%p322_p10)
}
  0x19   :  { %s326_s30 = scalar_lea.vmem %s27_s12, 256  ;;  %p331_p12 = scmp.lt.s32.totalorder %s27_s12, %s27_s12 }
  0x1a   :  { %p327_p11 = scmp.ne.s32.totalorder %s27_s12, %s326_s30  ;;  %p332_p13 = scmp.lt.s32.totalorder %s326_s30, %s326_s30 }
  0x1c   :  { %p333_p0 = por %p332_p13, %p331_p12 }
  0x1e   :  { %p334_p1 = pnand %p333_p0, %p327_p11 }
  0x20   :  { %337 = shalt.err (!%p334_p1)
}
  0x21   :  { %29 = dma.hbm_to_vmem [thread:$0]  %s485_s1, 256, %s27_s12, [#allocation6]  }
  0x22   :  { %360 = dma.done.wait [#allocation3], 256  }
  0x23   :  { %361 = vsyncadd [#allocation3], 4294967040 }
  0x24   :  { %362 = dma.done.wait [#allocation6], 256  }
  0x25   :  { %363 = vsyncadd [#allocation6], 4294967040  ;;  %v48_v0 = vlaneseq  ;;  %v368_v1 = vmov 1983009808   ;;  %v415_v6 = vld [vmem:[#allocation2] sm:$0xff]  ;;  %v417_v7 = vld [vmem:[#allocation2 + $0x8] sm:$0xff] }
  0x26   :  { %v46_v2 = vunpack.c.l.s4 %v368_v1  ;;  %v419_v8 = vld [vmem:[#allocation5] sm:$0xff]  ;;  %v40_v9 = vmul.f32 %v415_v6, %v415_v6  ;;  %v41_v10 = vmul.f32 %v417_v7, %v417_v7  ;;  %v425_v11 = vld [vmem:[#allocation5 + $0x8] sm:$0xff]  ;;  %vm86_vm0 = vcmask 1041408   ;;  %s370_s1 = smov [#allocation7]  }
  0x27   :  { %v410_v3 = vshrl.u32 %v48_v0, 7  ;;  %v106_v12 = vmul.f32 %v419_v8, %v419_v8  ;;  %v107_v15 = vmul.f32 %v425_v11, %v425_v11  ;;  %s273_s4 = sshll.u32 %s370_s1, 4  ;;  %s274_s4 = int_to_ptr.vmem [resolvable:$true] %s273_s4 }
  0x28   :  { %v47_v4 = vunpack.c.0.s8 %v46_v2  ;;  %v44_v13 = vcombine.high %v40_v9, %v40_v9  ;;  %v61_v20 = vcombine.high %v41_v10, %v41_v10  ;;  %v369_v2 = vmov 269488144   ;;  %s338_s6 = scalar_lea.vmem %s274_s4, 16  ;;  %s342_s7 = scalar_lea.vmem %s274_s4, 32 }
  0x29   :  { %v110_v16 = vcombine.high %v106_v12, %v106_v12  ;;  %v127_v30 = vcombine.high %v107_v15, %v107_v15  ;;  %p339_p2 = scmp.ne.s32.totalorder %s274_s4, %s338_s6  ;;  %p343_p3 = scmp.lt.s32.totalorder %s274_s4, %s274_s4 }
  0x2a   :  { %v413_v5 = vsub.s32 %v47_v4, %v410_v3  ;;  %v173_v4 = vunpack.c.l.s4 %v369_v2  ;;  %p344_p4 = scmp.lt.s32.totalorder %s342_s7, %s338_s6 }
  0x2c   :  { %v51_v14 = vrot.slane %v40_v9, %v413_v5  ;;  %v117_v17 = vrot.slane %v106_v12, %v413_v5  ;;  %v58_v18 = vrot.slane %v44_v13, %v413_v5  ;;  %v68_v21 = vrot.slane %v41_v10, %v413_v5  ;;  %p345_p5 = por %p344_p4, %p343_p3 }
  0x2d   :  { %v124_v23 = vrot.slane %v110_v16, %v413_v5  ;;  %v134_v31 = vrot.slane %v107_v15, %v413_v5  ;;  %v75_v32 = vrot.slane %v61_v20, %v413_v5  ;;  %v141_v42 = vrot.slane %v127_v30, %v413_v5 }
  0x2e   :  { %v59_v19 = vcombine.high %v51_v14, %v51_v14  ;;  %v87_v22 = vsel %vm86_vm0, %v51_v14, 0.0  ;;  %v125_v24 = vcombine.high %v117_v17, %v117_v17  ;;  %v60_v25 = vcombine.high %v58_v18, %v58_v18  ;;  %p346_p6 = pnand %p345_p5, %p339_p2 }
  0x2f   :  { %v90_v27 = vsel %vm86_vm0, %v58_v18, 0.0  ;;  %v126_v29 = vcombine.high %v124_v23, %v124_v23  ;;  %v76_v33 = vcombine.high %v68_v21, %v68_v21  ;;  %v152_v36 = vsel %vm86_vm0, %v117_v17, 0.0 }
  0x30   :  { %v88_v26 = vsel %vm86_vm0, %v59_v19, 0.0  ;;  %v92_v34 = vsel %vm86_vm0, %v60_v25, 0.0  ;;  %v153_v37 = vsel %vm86_vm0, %v125_v24, 0.0  ;;  %v155_v38 = vsel %vm86_vm0, %v124_v23, 0.0 }
  0x31   :  { %v89_v28 = vadd.f32 %v88_v26, %v87_v22  ;;  %v94_v39 = vsel %vm86_vm0, %v68_v21, 0.0  ;;  %v154_v40 = vadd.f32 %v153_v37, %v152_v36  ;;  %v142_v43 = vcombine.high %v134_v31, %v134_v31 }
  0x32   :  { %v157_v44 = vsel %vm86_vm0, %v126_v29, 0.0  ;;  %v77_v45 = vcombine.high %v75_v32, %v75_v32  ;;  %v96_v46 = vsel %vm86_vm0, %v76_v33, 0.0  ;;  %v159_v49 = vsel %vm86_vm0, %v134_v31, 0.0 }
  0x33   :  { %v91_v35 = vadd.f32 %v90_v27, %v89_v28  ;;  %v156_v47 = vadd.f32 %v155_v38, %v154_v40  ;;  %v98_v50 = vsel %vm86_vm0, %v75_v32, 0.0  ;;  %v143_v53 = vcombine.high %v141_v42, %v141_v42 }
  0x34   :  { %v161_v54 = vsel %vm86_vm0, %v142_v43, 0.0  ;;  %v100_v55 = vsel %vm86_vm0, %v77_v45, 0.0  ;;  %v163_v58 = vsel %vm86_vm0, %v141_v42, 0.0  ;;  %v174_v12 = vunpack.c.0.s8 %v173_v4 }
  0x35   :  { %v93_v41 = vadd.f32 %v92_v34, %v91_v35  ;;  %v158_v51 = vadd.f32 %v157_v44, %v156_v47  ;;  %v165_v61 = vsel %vm86_vm0, %v143_v53, 0.0 }
  0x36   :  { %v177_v13 = vsub.s32 %v174_v12, %v410_v3 }
  0x37   :  { %v95_v48 = vadd.f32 %v94_v39, %v93_v41  ;;  %v160_v56 = vadd.f32 %v159_v49, %v158_v51 }
  0x39   :  { %v97_v52 = vadd.f32 %v96_v46, %v95_v48  ;;  %v162_v59 = vadd.f32 %v161_v54, %v160_v56 }
  0x3b   :  { %v99_v57 = vadd.f32 %v98_v50, %v97_v52  ;;  %v164_v62 = vadd.f32 %v163_v58, %v162_v59 }
  0x3d   :  { %v101_v60 = vadd.f32 %v100_v55, %v99_v57  ;;  %v166_v63 = vadd.f32 %v165_v61, %v164_v62 }
  0x3f   :  { %102 = vadd.xlane.f32.xlu0 %v101_v60 }
  0x43   :  { %167 = vadd.xlane.f32.xlu0 %v166_v63 }
  0xcc   :  { %v103_v0 = vpop.xlane.xlu0 %102 }
  0xcd   :  { %v104_v1 = vmax.f32 %v103_v0, 1e-24 }
  0xcf   :  { %290 = vrsqrt.f32 %v104_v1 }
  0xd0   :  { %v168_v9 = vpop.xlane.xlu0 %167 }
  0xd1   :  { %v169_v10 = vmax.f32 %v168_v9, 1e-24 }
  0xd3   :  { %292 = vrsqrt.f32 %v169_v10 }
  0xd9   :  { %v291_v14 = vpop.eup %290 }
  0xda   :  { %v178_v15 = vrot.slane %v291_v14, %v177_v13 }
  0xdc   :  { %v180_v18 = vmul.f32 %v178_v15, %v415_v6  ;;  %v181_v20 = vmul.f32 %v178_v15, %v417_v7 }
  0xdd   :  { %v293_v16 = vpop.eup %292 }
  0xde   :  { %v189_v17 = vrot.slane %v293_v16, %v177_v13 }
  0xe0   :  { %v191_v19 = vmul.f32 %v189_v17, %v419_v8  ;;  %v192_v21 = vmul.f32 %v189_v17, %v425_v11 }
  0xe2   :  { %v193_v22 = vsub.f32 %v180_v18, %v191_v19  ;;  %v194_v23 = vsub.f32 %v181_v20, %v192_v21 }
  0xe4   :  { %v195_v24 = vand.u32 2147483647, %v193_v22  ;;  %v196_v25 = vand.u32 2147483647, %v194_v23 }
  0xe6   :  { %v199_v26 = vcombine.high %v195_v24, %v195_v24  ;;  %v206_v27 = vrot.slane %v195_v24, %v413_v5  ;;  %v216_v29 = vcombine.high %v196_v25, %v196_v25  ;;  %v223_v6 = vrot.slane %v196_v25, %v413_v5 }
  0xe8   :  { %v213_v3 = vrot.slane %v199_v26, %v413_v5  ;;  %v214_v28 = vcombine.high %v206_v27, %v206_v27  ;;  %v241_v8 = vsel %vm86_vm0, %v206_v27, 0.0  ;;  %v230_v33 = vrot.slane %v216_v29, %v413_v5 }
  0xe9   :  { %v231_v34 = vcombine.high %v223_v6, %v223_v6  ;;  %v248_v37 = vsel %vm86_vm0, %v223_v6, 0.0 }
  0xea   :  { %v215_v30 = vcombine.high %v213_v3, %v213_v3  ;;  %v242_v7 = vsel %vm86_vm0, %v214_v28, 0.0  ;;  %v244_v11 = vsel %vm86_vm0, %v213_v3, 0.0  ;;  %v232_v39 = vcombine.high %v230_v33, %v230_v33 }
  0xeb   :  { %v243_v31 = vadd.f32 %v242_v7, %v241_v8  ;;  %v250_v40 = vsel %vm86_vm0, %v231_v34, 0.0  ;;  %v252_v42 = vsel %vm86_vm0, %v230_v33, 0.0 }
  0xec   :  { %v246_v35 = vsel %vm86_vm0, %v215_v30, 0.0  ;;  %v254_v44 = vsel %vm86_vm0, %v232_v39, 0.0 }
  0xed   :  { %v245_v32 = vadd.f32 %v244_v11, %v243_v31 }
  0xef   :  { %v247_v36 = vadd.f32 %v246_v35, %v245_v32 }
  0xf1   :  { %v249_v38 = vadd.f32 %v248_v37, %v247_v36 }
  0xf3   :  { %v251_v41 = vadd.f32 %v250_v40, %v249_v38 }
  0xf5   :  { %v253_v43 = vadd.f32 %v252_v42, %v251_v41 }
  0xf7   :  { %v255_v45 = vadd.f32 %v254_v44, %v253_v43 }
  0xf9   :  { %256 = vadd.xlane.f32.xlu1 %v255_v45 }
 0x186   :  { %v257_v46 = vpop.xlane.xlu1 %256 }
 0x187   :  { %v258_v5 = vrot.slane %v257_v46, 4 }
 0x189   :  { %v259_v47 = vadd.f32 %v258_v5, %v257_v46 }
 0x18b   :  { %v260_v48 = vrot.slane %v259_v47, 2 }
 0x18d   :  { %v261_v49 = vadd.f32 %v260_v48, %v259_v47 }
 0x18f   :  { %v262_v50 = vrot.slane %v261_v49, 1 }
 0x191   :  { %v263_v51 = vadd.f32 %v262_v50, %v261_v49 }
 0x193   :  { %283 = vpush %v263_v51 }
 0x1c4   :  { %s284_s5 = spop %283 }
 0x1c5   :  { %v265_v52 = vstv %s284_s5 }
 0x1c6   :  { %266 = vst [vmem:[#allocation7] sm:$0x1] %v265_v52 }
 0x1c7   :  { %349 = shalt.err (!%p346_p6)
}
 0x1c8   :  { %s350_s10 = scalar_lea.hbm %s486_s2, 16 }
 0x1c9   :  { %p351_p7 = scmp.ne.s32.totalorder %s486_s2, %s350_s10  ;;  %p354_p8 = scmp.lt.u32.totalorder %s350_s10, %s486_s2 }
 0x1cb   :  { %p356_p9 = pnand %p354_p8, %p351_p7 }
 0x1cd   :  { %359 = shalt.err (!%p356_p9)
}
 0x1ce   :  { %276 = dma.vmem_to_hbm [thread:$0]  %s274_s4, 16, %s486_s2, [#allocation4]  }
 0x1cf   :  { %364 = dma.done.wait [#allocation4], 16  }
 0x1d0   :  { %365 = vsyncadd [#allocation4], 4294967280 }
 0x1d1   :  { %280 = vsyncpa [#allocation3], 1 }
 0x1d2   :  { %281 = vsyncpa [#allocation6], 1 }
 0x1d3   :  { %282 = vsyncpa [#allocation4], 1 }

</bundles_post_ra>
